<compile_context>
chip_gen: v5e
topology: v5e:2x2
jax: 0.10.0
libtpu: 0.0.40
codegen_flags: <defaults>
</compile_context>

<pallas_src>
import jax
import jax.numpy as jnp
from jax.experimental import pallas as pl
from jax.experimental.pallas import tpu as pltpu

K_IN = 784
K_PAD = 896  # 7 * 128: lane-aligned K for the first (dominant) matmul.


def _round_up(n, m):
    return ((n + m - 1) // m) * m


def _choose_tile_b(B, tile_b):
    """Batch tile: multiple of 8 sublanes, <= tile_b, and small enough that the
       grid has >= 2 steps once B >= 16 (so v7x megacore can shard the batch)."""
    b8 = _round_up(B, 8)
    if b8 <= 8:
        return b8
    return max(8, min(tile_b, _round_up(pl.cdiv(b8, 2), 8)))


def _classifier_kernel(x_ref,
                       w1_ref, b1_ref,
                       w2_ref, b2_ref,
                       w3_ref, b3_ref,
                       w4_ref, b4_ref,
                       w5t_ref, b5_ref,
                       o_ref):
    """One (tb, 896) bf16 batch tile of:
       relu(e1) -> relu(e2) -> relu(lv) -> relu(linear1) -> sigmoid(linear2).
       bf16 matmul operands, f32 accumulation / elementwise math.
       The final 1-wide layer is computed transposed -> (1, tb) lane-dense out."""
    x = x_ref[...]                                                    # bf16

    # encoder.get_embedding
    h = jnp.dot(x, w1_ref[...], preferred_element_type=jnp.float32) + b1_ref[...]
    h = jnp.maximum(h, 0.0)                                           # relu(e1)
    h = jnp.dot(h.astype(jnp.bfloat16), w2_ref[...],
                preferred_element_type=jnp.float32) + b2_ref[...]
    h = jnp.maximum(h, 0.0)                                           # relu(e2)
    h = jnp.dot(h.astype(jnp.bfloat16), w3_ref[...],
                preferred_element_type=jnp.float32) + b3_ref[...]
    h = jnp.maximum(h, 0.0)                                           # relu(lv)

    # classifier head
    h = jnp.dot(h.astype(jnp.bfloat16), w4_ref[...],
                preferred_element_type=jnp.float32) + b4_ref[...]
    h = jnp.maximum(h, 0.0)                                           # relu(linear1), (tb, 32)

    # linear2 computed transposed so the output block is lane-dense:
    # (1, 32) @ (32, tb) -> (1, tb).
    z_t = jnp.dot(w5t_ref[...], h.astype(jnp.bfloat16).T,
                  preferred_element_type=jnp.float32) + b5_ref[...]

    # sigmoid: exp + approx reciprocal both land on the EUP slot; clamp so the
    # approx error can never push the probability outside [0, 1].
    sig = pl.reciprocal(1.0 + jnp.exp(-z_t), approx=True)
    o_ref[...] = jnp.clip(sig, 0.0, 1.0)


def prepare_params(params):
    """One-time weight prep (do NOT redo per step):
       - weights already transposed from PyTorch (out, in) to (in, out),
       - cast matmul operands to bf16,
       - zero-pad w1's K dim 784 -> 896,
       - store w5 transposed as (1, 32) so the last layer runs in the
         lane-dense orientation,
       - biases stay f32, shape (1, out); b5 stays (1, 1)."""
    w1 = jnp.zeros((K_PAD, 256), jnp.bfloat16).at[:K_IN, :].set(
        params["w1"].astype(jnp.bfloat16))
    prepped = {"w1": w1}
    for i in range(2, 5):
        prepped[f"w{i}"] = params[f"w{i}"].astype(jnp.bfloat16)
    prepped["w5t"] = params["w5"].astype(jnp.bfloat16).T      # (1, 32)
    for i in range(1, 6):
        prepped[f"b{i}"] = params[f"b{i}"].astype(jnp.float32)
    return prepped


def mnist_classifier_forward(x, prepped, *, tile_b=1024):
    """x: (B, 784) float (or an already bf16, (B, 896) zero-padded batch).
       prepped: output of prepare_params. Returns (B, 1) f32 probabilities."""
    B, feat = x.shape
    assert feat in (K_IN, K_PAD), feat

    tb = _choose_tile_b(B, tile_b)
    b_pad = _round_up(B, tb)
    n_tiles = b_pad // tb

    if x.dtype == jnp.bfloat16 and feat == K_PAD and b_pad == B:
        x_in = x                                   # zero-copy fast path
    else:
        # Single fused pad+cast op: bf16 halves the extra HBM pass vs. f32.
        x_in = (jnp.zeros((b_pad, K_PAD), jnp.bfloat16)
                .at[:B, :feat].set(x.astype(jnp.bfloat16)))

    operands = (
        x_in,
        prepped["w1"], prepped["b1"],
        prepped["w2"], prepped["b2"],
        prepped["w3"], prepped["b3"],
        prepped["w4"], prepped["b4"],
        prepped["w5t"], prepped["b5"],
    )

    # Params: full-array blocks with a constant index_map -> fetched once,
    # VMEM-resident across all grid steps while x tiles are double-buffered.
    def pinned(arr):
        return pl.BlockSpec(arr.shape, lambda i: (0, 0))

    in_specs = [pl.BlockSpec((tb, K_PAD), lambda i: (i, 0))]
    in_specs += [pinned(op) for op in operands[1:]]
    # Lane-dense output: (n_tiles, tb) slab, one (1, tb) row per grid step.
    out_spec = pl.BlockSpec((1, tb), lambda i: (i, 0))

    out = pl.pallas_call(
        _classifier_kernel,
        out_shape=jax.ShapeDtypeStruct((n_tiles, tb), jnp.float32),
        grid_spec=pltpu.PrefetchScalarGridSpec(
            num_scalar_prefetch=0,
            grid=(n_tiles,),
            in_specs=in_specs,
            out_specs=out_spec,
        ),
        compiler_params=pltpu.CompilerParams(
            dimension_semantics=("parallel",)),
    )(*operands)

    # Row-major per tile: out[i, j] is batch row i*tb + j -> plain reshape.
    return out.reshape(b_pad, 1)[:B]


def init_params(key):
    """Deterministic init matching PyTorch nn.Linear shapes.
       PyTorch weight (out, in) -> stored transposed (in, out); bias -> (1, out)."""
    dims = [(784, 256), (256, 128), (128, 64), (64, 32), (32, 1)]
    params = {}
    keys = jax.random.split(key, 2 * len(dims))
    for i, (fan_in, fan_out) in enumerate(dims):
        bound = 1.0 / jnp.sqrt(jnp.float32(fan_in))
        w = jax.random.uniform(keys[2 * i], (fan_in, fan_out),
                               minval=-bound, maxval=bound, dtype=jnp.float32)
        b = jax.random.uniform(keys[2 * i + 1], (1, fan_out),
                               minval=-bound, maxval=bound, dtype=jnp.float32)
        params[f"w{i + 1}"] = w
        params[f"b{i + 1}"] = b
    return params


if __name__ == "__main__":
    key = jax.random.PRNGKey(0)
    k_x, k_p = jax.random.split(key)

    B = 8
    x = jax.random.normal(k_x, (B, K_IN), dtype=jnp.float32)
    params = init_params(k_p)
    prepped = prepare_params(params)

    out = mnist_classifier_forward(x, prepped)
    out = jax.block_until_ready(out)

    # Sanity: correct shape, values inside sigmoid range (clamped in-kernel).
    assert out.shape == (B, 1), out.shape
    assert bool(jnp.all(jnp.isfinite(out)))
    assert bool(jnp.all((out >= 0.0) & (out <= 1.0)))

    # Reference 1: same bf16-operand / f32-accumulate recipe (tight check).
    def ref_bf16(x, pp):
        def dense(h, w, b):
            return jnp.dot(h.astype(jnp.bfloat16), w,
                           preferred_element_type=jnp.float32) + b
        xp = jnp.zeros((x.shape[0], K_PAD), jnp.float32).at[:, :K_IN].set(x)
        h = jax.nn.relu(dense(xp, pp["w1"], pp["b1"]))
        h = jax.nn.relu(dense(h, pp["w2"], pp["b2"]))
        h = jax.nn.relu(dense(h, pp["w3"], pp["b3"]))
        h = jax.nn.relu(dense(h, pp["w4"], pp["b4"]))
        z = dense(h, pp["w5t"].T, pp["b5"])
        return jax.nn.sigmoid(z)

    # Reference 2: the original full-f32 PyTorch-equivalent forward (loose check).
    def ref_f32(x, p):
        h = jax.nn.relu(x @ p["w1"] + p["b1"])
        h = jax.nn.relu(h @ p["w2"] + p["b2"])
        h = jax.nn.relu(h @ p["w3"] + p["b3"])
        h = jax.nn.relu(h @ p["w4"] + p["b4"])
        return jax.nn.sigmoid(h @ p["w5"] + p["b5"])

    assert bool(jnp.allclose(out, ref_bf16(x, prepped), atol=5e-3, rtol=0.0))
    assert bool(jnp.allclose(out, ref_f32(x, params), atol=3e-2, rtol=0.0))

    print("KERNEL_OK")
</pallas_src>

<mosaic_0001>
module attributes {stable_mosaic.version = 11 : i64} {
  func.func @_classifier_kernel(%arg0: i32, %arg1: memref<8x896xbf16, #tpu.memory_space<vmem>>, %arg2: memref<896x256xbf16, #tpu.memory_space<vmem>>, %arg3: memref<1x256xf32, #tpu.memory_space<vmem>>, %arg4: memref<256x128xbf16, #tpu.memory_space<vmem>>, %arg5: memref<1x128xf32, #tpu.memory_space<vmem>>, %arg6: memref<128x64xbf16, #tpu.memory_space<vmem>>, %arg7: memref<1x64xf32, #tpu.memory_space<vmem>>, %arg8: memref<64x32xbf16, #tpu.memory_space<vmem>>, %arg9: memref<1x32xf32, #tpu.memory_space<vmem>>, %arg10: memref<1x32xbf16, #tpu.memory_space<vmem>>, %arg11: memref<1x1xf32, #tpu.memory_space<vmem>>, %arg12: memref<1x8xf32, #tpu.memory_space<vmem>>) attributes {dimension_semantics = [#tpu.dimension_semantics<parallel>], iteration_bounds = array<i64: 1>, scalar_prefetch = 0 : i64, scratch_operands = 0 : i64, tpu.core_type = #tpu.core_type<tc>, window_params = [{transform_indices = @transform_0, window_bounds = array<i64: 8, 896>}, {pipeline_mode = #tpu.pipeline_mode<synchronous>, transform_indices = @transform_1, window_bounds = array<i64: 896, 256>}, {pipeline_mode = #tpu.pipeline_mode<synchronous>, transform_indices = @transform_2, window_bounds = array<i64: 1, 256>}, {pipeline_mode = #tpu.pipeline_mode<synchronous>, transform_indices = @transform_3, window_bounds = array<i64: 256, 128>}, {pipeline_mode = #tpu.pipeline_mode<synchronous>, transform_indices = @transform_4, window_bounds = array<i64: 1, 128>}, {pipeline_mode = #tpu.pipeline_mode<synchronous>, transform_indices = @transform_5, window_bounds = array<i64: 128, 64>}, {pipeline_mode = #tpu.pipeline_mode<synchronous>, transform_indices = @transform_6, window_bounds = array<i64: 1, 64>}, {pipeline_mode = #tpu.pipeline_mode<synchronous>, transform_indices = @transform_7, window_bounds = array<i64: 64, 32>}, {pipeline_mode = #tpu.pipeline_mode<synchronous>, transform_indices = @transform_8, window_bounds = array<i64: 1, 32>}, {pipeline_mode = #tpu.pipeline_mode<synchronous>, transform_indices = @transform_9, window_bounds = array<i64: 1, 32>}, {pipeline_mode = #tpu.pipeline_mode<synchronous>, transform_indices = @transform_10, window_bounds = array<i64: 1, 1>}, {transform_indices = @transform_11, window_bounds = array<i64: 1, 8>}]} {
    %c0 = arith.constant 0 : index
    %c0_0 = arith.constant 0 : index
    %0 = vector.load %arg1[%c0, %c0_0] : memref<8x896xbf16, #tpu.memory_space<vmem>>, vector<8x896xbf16>
    %c0_1 = arith.constant 0 : index
    %c0_2 = arith.constant 0 : index
    %1 = vector.load %arg2[%c0_1, %c0_2] : memref<896x256xbf16, #tpu.memory_space<vmem>>, vector<896x256xbf16>
    %cst = arith.constant dense<0.000000e+00> : vector<8x256xf32>
    %2 = tpu.matmul %0, %1, %cst {dimension_numbers = #tpu.dot_dimension_numbers<[1], [0], [0], [1], [0, 0, 1, 1], [], []>} : vector<8x896xbf16>, vector<896x256xbf16>, vector<8x256xf32> -> vector<8x256xf32>
    %c0_3 = arith.constant 0 : index
    %c0_4 = arith.constant 0 : index
    %3 = vector.load %arg3[%c0_3, %c0_4] : memref<1x256xf32, #tpu.memory_space<vmem>>, vector<1x256xf32>
    %4 = vector.broadcast %3 : vector<1x256xf32> to vector<8x256xf32>
    %5 = arith.addf %2, %4 : vector<8x256xf32>
    %cst_5 = arith.constant 0.000000e+00 : f32
    %6 = vector.broadcast %cst_5 : f32 to vector<8x256xf32>
    %7 = arith.maximumf %5, %6 : vector<8x256xf32>
    %8 = arith.truncf %7 : vector<8x256xf32> to vector<8x256xbf16>
    %c0_6 = arith.constant 0 : index
    %c0_7 = arith.constant 0 : index
    %9 = vector.load %arg4[%c0_6, %c0_7] : memref<256x128xbf16, #tpu.memory_space<vmem>>, vector<256x128xbf16>
    %cst_8 = arith.constant dense<0.000000e+00> : vector<8x128xf32>
    %10 = tpu.matmul %8, %9, %cst_8 {dimension_numbers = #tpu.dot_dimension_numbers<[1], [0], [0], [1], [0, 0, 1, 1], [], []>} : vector<8x256xbf16>, vector<256x128xbf16>, vector<8x128xf32> -> vector<8x128xf32>
    %c0_9 = arith.constant 0 : index
    %c0_10 = arith.constant 0 : index
    %11 = vector.load %arg5[%c0_9, %c0_10] : memref<1x128xf32, #tpu.memory_space<vmem>>, vector<1x128xf32>
    %12 = vector.broadcast %11 : vector<1x128xf32> to vector<8x128xf32>
    %13 = arith.addf %10, %12 : vector<8x128xf32>
    %cst_11 = arith.constant 0.000000e+00 : f32
    %14 = vector.broadcast %cst_11 : f32 to vector<8x128xf32>
    %15 = arith.maximumf %13, %14 : vector<8x128xf32>
    %16 = arith.truncf %15 : vector<8x128xf32> to vector<8x128xbf16>
    %c0_12 = arith.constant 0 : index
    %c0_13 = arith.constant 0 : index
    %17 = vector.load %arg6[%c0_12, %c0_13] : memref<128x64xbf16, #tpu.memory_space<vmem>>, vector<128x64xbf16>
    %cst_14 = arith.constant dense<0.000000e+00> : vector<8x64xf32>
    %18 = tpu.matmul %16, %17, %cst_14 {dimension_numbers = #tpu.dot_dimension_numbers<[1], [0], [0], [1], [0, 0, 1, 1], [], []>} : vector<8x128xbf16>, vector<128x64xbf16>, vector<8x64xf32> -> vector<8x64xf32>
    %c0_15 = arith.constant 0 : index
    %c0_16 = arith.constant 0 : index
    %19 = vector.load %arg7[%c0_15, %c0_16] : memref<1x64xf32, #tpu.memory_space<vmem>>, vector<1x64xf32>
    %20 = vector.broadcast %19 : vector<1x64xf32> to vector<8x64xf32>
    %21 = arith.addf %18, %20 : vector<8x64xf32>
    %cst_17 = arith.constant 0.000000e+00 : f32
    %22 = vector.broadcast %cst_17 : f32 to vector<8x64xf32>
    %23 = arith.maximumf %21, %22 : vector<8x64xf32>
    %24 = arith.truncf %23 : vector<8x64xf32> to vector<8x64xbf16>
    %c0_18 = arith.constant 0 : index
    %c0_19 = arith.constant 0 : index
    %25 = vector.load %arg8[%c0_18, %c0_19] : memref<64x32xbf16, #tpu.memory_space<vmem>>, vector<64x32xbf16>
    %cst_20 = arith.constant dense<0.000000e+00> : vector<8x32xf32>
    %26 = tpu.matmul %24, %25, %cst_20 {dimension_numbers = #tpu.dot_dimension_numbers<[1], [0], [0], [1], [0, 0, 1, 1], [], []>} : vector<8x64xbf16>, vector<64x32xbf16>, vector<8x32xf32> -> vector<8x32xf32>
    %c0_21 = arith.constant 0 : index
    %c0_22 = arith.constant 0 : index
    %27 = vector.load %arg9[%c0_21, %c0_22] : memref<1x32xf32, #tpu.memory_space<vmem>>, vector<1x32xf32>
    %28 = vector.broadcast %27 : vector<1x32xf32> to vector<8x32xf32>
    %29 = arith.addf %26, %28 : vector<8x32xf32>
    %cst_23 = arith.constant 0.000000e+00 : f32
    %30 = vector.broadcast %cst_23 : f32 to vector<8x32xf32>
    %31 = arith.maximumf %29, %30 : vector<8x32xf32>
    %c0_24 = arith.constant 0 : index
    %c0_25 = arith.constant 0 : index
    %32 = vector.load %arg10[%c0_24, %c0_25] : memref<1x32xbf16, #tpu.memory_space<vmem>>, vector<1x32xbf16>
    %33 = arith.truncf %31 : vector<8x32xf32> to vector<8x32xbf16>
    %34 = tpu.transpose %33, [1, 0] : vector<8x32xbf16> -> vector<32x8xbf16>
    %cst_26 = arith.constant dense<0.000000e+00> : vector<1x8xf32>
    %35 = tpu.matmul %32, %34, %cst_26 {dimension_numbers = #tpu.dot_dimension_numbers<[1], [0], [0], [1], [0, 0, 1, 1], [], []>} : vector<1x32xbf16>, vector<32x8xbf16>, vector<1x8xf32> -> vector<1x8xf32>
    %c0_27 = arith.constant 0 : index
    %c0_28 = arith.constant 0 : index
    %36 = vector.load %arg11[%c0_27, %c0_28] : memref<1x1xf32, #tpu.memory_space<vmem>>, vector<1x1xf32>
    %37 = vector.broadcast %36 : vector<1x1xf32> to vector<1x8xf32>
    %38 = arith.addf %35, %37 : vector<1x8xf32>
    %cst_29 = arith.constant 0.000000e+00 : f32
    %39 = vector.broadcast %cst_29 : f32 to vector<1x8xf32>
    %40 = arith.subf %39, %38 : vector<1x8xf32>
    %41 = math.exp %40 : vector<1x8xf32>
    %cst_30 = arith.constant 1.000000e+00 : f32
    %42 = vector.broadcast %cst_30 : f32 to vector<1x8xf32>
    %43 = arith.addf %42, %41 : vector<1x8xf32>
    %44 = tpu.reciprocal %43 {approx = true} : vector<1x8xf32> -> vector<1x8xf32>
    %cst_31 = arith.constant 0.000000e+00 : f32
    %cst_32 = arith.constant 1.000000e+00 : f32
    %45 = vector.broadcast %cst_31 : f32 to vector<1x8xf32>
    %46 = arith.maximumf %45, %44 : vector<1x8xf32>
    %47 = vector.broadcast %cst_32 : f32 to vector<1x8xf32>
    %48 = arith.minimumf %47, %46 : vector<1x8xf32>
    %c0_33 = arith.constant 0 : index
    %c0_34 = arith.constant 0 : index
    %49 = vector.load %arg12[%c0_33, %c0_34] : memref<1x8xf32, #tpu.memory_space<vmem>>, vector<1x8xf32>
    tpu.vector_store %arg12[%c0_33, %c0_34], %48 {strides = array<i32>} : memref<1x8xf32, #tpu.memory_space<vmem>>, vector<1x8xf32>,
    return
  }
  func.func @transform_0(%arg0: i32) -> (i32, i32) {
    %c0_i32 = arith.constant 0 : i32
    %c0_i32_0 = arith.constant 0 : i32
    return %arg0, %c0_i32 : i32, i32
  }
  func.func @transform_1(%arg0: i32) -> (i32, i32) {
    %c0_i32 = arith.constant 0 : i32
    %c0_i32_0 = arith.constant 0 : i32
    %c0_i32_1 = arith.constant 0 : i32
    return %c0_i32, %c0_i32_0 : i32, i32
  }
  func.func @transform_2(%arg0: i32) -> (i32, i32) {
    %c0_i32 = arith.constant 0 : i32
    %c0_i32_0 = arith.constant 0 : i32
    %c0_i32_1 = arith.constant 0 : i32
    return %c0_i32, %c0_i32_0 : i32, i32
  }
  func.func @transform_3(%arg0: i32) -> (i32, i32) {
    %c0_i32 = arith.constant 0 : i32
    %c0_i32_0 = arith.constant 0 : i32
    %c0_i32_1 = arith.constant 0 : i32
    return %c0_i32, %c0_i32_0 : i32, i32
  }
  func.func @transform_4(%arg0: i32) -> (i32, i32) {
    %c0_i32 = arith.constant 0 : i32
    %c0_i32_0 = arith.constant 0 : i32
    %c0_i32_1 = arith.constant 0 : i32
    return %c0_i32, %c0_i32_0 : i32, i32
  }
  func.func @transform_5(%arg0: i32) -> (i32, i32) {
    %c0_i32 = arith.constant 0 : i32
    %c0_i32_0 = arith.constant 0 : i32
    %c0_i32_1 = arith.constant 0 : i32
    return %c0_i32, %c0_i32_0 : i32, i32
  }
  func.func @transform_6(%arg0: i32) -> (i32, i32) {
    %c0_i32 = arith.constant 0 : i32
    %c0_i32_0 = arith.constant 0 : i32
    %c0_i32_1 = arith.constant 0 : i32
    return %c0_i32, %c0_i32_0 : i32, i32
  }
  func.func @transform_7(%arg0: i32) -> (i32, i32) {
    %c0_i32 = arith.constant 0 : i32
    %c0_i32_0 = arith.constant 0 : i32
    %c0_i32_1 = arith.constant 0 : i32
    return %c0_i32, %c0_i32_0 : i32, i32
  }
  func.func @transform_8(%arg0: i32) -> (i32, i32) {
    %c0_i32 = arith.constant 0 : i32
    %c0_i32_0 = arith.constant 0 : i32
    %c0_i32_1 = arith.constant 0 : i32
    return %c0_i32, %c0_i32_0 : i32, i32
  }
  func.func @transform_9(%arg0: i32) -> (i32, i32) {
    %c0_i32 = arith.constant 0 : i32
    %c0_i32_0 = arith.constant 0 : i32
    %c0_i32_1 = arith.constant 0 : i32
    return %c0_i32, %c0_i32_0 : i32, i32
  }
  func.func @transform_10(%arg0: i32) -> (i32, i32) {
    %c0_i32 = arith.constant 0 : i32
    %c0_i32_0 = arith.constant 0 : i32
    %c0_i32_1 = arith.constant 0 : i32
    return %c0_i32, %c0_i32_0 : i32, i32
  }
  func.func @transform_11(%arg0: i32) -> (i32, i32) {
    %c0_i32 = arith.constant 0 : i32
    %c0_i32_0 = arith.constant 0 : i32
    return %arg0, %c0_i32 : i32, i32
  }
}

</mosaic_0001>

<bundles_post_ra>
// kernel: tpu_custom_call.1
= control target key start
LH: loop header
LB: loop body
LE: loop exit
PB: predicated region body
PF: predicated region fallthrough
CT: control target
= control target key end

     0   :  { %s2287_s0 = inlined_call_operand.vmem [shape: bf16[8,896], index: 0, kind: input, shape index: {}]   ;;  %s2288_s1 = inlined_call_operand.hbm [shape: bf16[896,256], index: 1, kind: input, shape index: {}]   ;;  %s2289_s2 = inlined_call_operand.vmem [shape: f32[1,256], index: 2, kind: input, shape index: {}]   ;;  %s2290_s3 = inlined_call_operand.hbm [shape: bf16[256,128], index: 3, kind: input, shape index: {}]   ;;  %s2291_s4 = inlined_call_operand.vmem [shape: f32[1,128], index: 4, kind: input, shape index: {}]   ;;  %s2292_s5 = inlined_call_operand.vmem [shape: bf16[128,64], index: 5, kind: input, shape index: {}]   ;;  %s2293_s6 = inlined_call_operand.vmem [shape: f32[1,64], index: 6, kind: input, shape index: {}]   ;;  %s2294_s7 = inlined_call_operand.vmem [shape: bf16[64,32], index: 7, kind: input, shape index: {}]   ;;  %s2295_s8 = inlined_call_operand.vmem [shape: f32[1,32], index: 8, kind: input, shape index: {}]   ;;  %s2296_s9 = inlined_call_operand.vmem [shape: bf16[1,32], index: 9, kind: input, shape index: {}]   ;;  %s2297_s10 = inlined_call_operand.<no memory space> [shape: f32[1,1], index: 10, kind: input, shape index: {}]   ;;  %s2298_s11 = inlined_call_operand.hbm [shape: f32[1,8], index: 11, kind: output, shape index: {}]  }
   0x1   :  { %v16_v0 = vstv %s2297_s10 }
   0x2   :  { %17 = vst [vmem:[#allocation2] sm:$0x1] %v16_v0 }
   0x3   :  { %18 = vsyncpa [#allocation4], 0 }
   0x4   :  { %19 = vsyncpa [#allocation7], 0 }
   0x5   :  { %20 = vsyncpa [#allocation5], 0  ;;  %s27_s21 = sshll.u32 %s2288_s1, 4  ;;  %s2116_s22 = smov [#allocation3]   ;;  %s28_s21 = int_to_ptr.hbm [resolvable:$true] %s27_s21 }
   0x6   :  { %s29_s23 = sshll.u32 %s2116_s22, 4  ;;  %s42_s26 = sshll.u32 %s2290_s3, 4  ;;  %s30_s23 = int_to_ptr.vmem [resolvable:$true] %s29_s23  ;;  %s43_s26 = int_to_ptr.hbm [resolvable:$true] %s42_s26 }
   0x7   :  { %s2117_s27 = smov 128   ;;  %s2118_s28 = smov 8  }
   0x8   :  { %35 = dma.hbm_to_vmem [thread:$0]  %s28_s21, 14336, %s30_s23, [#allocation4], %s2117_s27, %s2117_s27, %s2118_s28  }
   0x9   :  { %s2119_s10 = smov [#allocation6]   ;;  %s2120_s30 = smov 64  }
   0xa   :  { %s44_s29 = sshll.u32 %s2119_s10, 4  ;;  %s2121_s12 = smov 4   ;;  %s45_s29 = int_to_ptr.vmem [resolvable:$true] %s44_s29 }
   0xb   :  { %50 = dma.hbm_to_vmem [thread:$0]  %s43_s26, 2048, %s45_s29, [#allocation7], %s2120_s30, %s2120_s30, %s2121_s12  }
   0xc   :  { %2110 = dma.done.wait [#allocation4], 14336  }
   0xd   :  { %2111 = vsyncadd [#allocation4], 4294952960 }
   0xe   :  { %2112 = dma.done.wait [#allocation7], 2048  }
   0xf   :  { %2113 = vsyncadd [#allocation7], 4294965248  ;;  %v1378_v1 = vld [vmem:[#allocation3 + $0x70] sm:$0xf]  ;;  %v1897_v2 = vld [vmem:[#allocation3 + $0x74] sm:$0xf0] }
  0x10   :  { %v1442_v3 = vld [vmem:[#allocation3 + $0xf0] sm:$0xf]  ;;  %v1379_v4 = vor.u32 %v1897_v2, %v1378_v1  ;;  %v1913_v5 = vld [vmem:[#allocation3 + $0xf4] sm:$0xf0]  ;;  %v1370_v10 = vld [vmem:[#allocation3 + $0x60] sm:$0xf] }
  0x11   :  { %v1506_v6 = vld [vmem:[#allocation3 + $0x170] sm:$0xf]  ;;  %v1929_v7 = vld [vmem:[#allocation3 + $0x174] sm:$0xf0]  ;;  %v1443_v8 = vor.u32 %v1913_v5, %v1442_v3  ;;  %v1895_v11 = vld [vmem:[#allocation3 + $0x64] sm:$0xf0] }
  0x12   :  { %v1507_v9 = vor.u32 %v1929_v7, %v1506_v6  ;;  %v1434_v12 = vld [vmem:[#allocation3 + $0xe0] sm:$0xf]  ;;  %781 = vmatpush.bf16.msra.mxu0 %v1379_v4  ;;  %v1371_v13 = vor.u32 %v1895_v11, %v1370_v10  ;;  %v1911_v14 = vld [vmem:[#allocation3 + $0xe4] sm:$0xf0]  ;;  %v1362_v19 = vld [vmem:[#allocation3 + $0x50] sm:$0xf] }
  0x13   :  { %v1498_v15 = vld [vmem:[#allocation3 + $0x160] sm:$0xf]  ;;  %v1927_v16 = vld [vmem:[#allocation3 + $0x164] sm:$0xf0]  ;;  %794 = vmatpush.bf16.msra.mxu1 %v1443_v8  ;;  %v1435_v17 = vor.u32 %v1911_v14, %v1434_v12  ;;  %v1893_v20 = vld [vmem:[#allocation3 + $0x54] sm:$0xf0] }
  0x14   :  { %807 = vmatpush.bf16.msra.mxu2 %v1507_v9  ;;  %v1499_v18 = vor.u32 %v1927_v16, %v1498_v15  ;;  %v1426_v21 = vld [vmem:[#allocation3 + $0xd0] sm:$0xf]  ;;  %v1909_v22 = vld [vmem:[#allocation3 + $0xd4] sm:$0xf0]  ;;  %v1363_v25 = vor.u32 %v1893_v20, %v1362_v19  ;;  %v1354_v26 = vld [vmem:[#allocation3 + $0x40] sm:$0xf] }
  0x15   :  { %v1490_v23 = vld [vmem:[#allocation3 + $0x150] sm:$0xf]  ;;  %v1925_v24 = vld [vmem:[#allocation3 + $0x154] sm:$0xf0]  ;;  %v1891_v27 = vld [vmem:[#allocation3 + $0x44] sm:$0xf0]  ;;  %v1427_v28 = vor.u32 %v1909_v22, %v1426_v21 }
  0x16   :  { %782 = vmatpush.bf16.msra.mxu0 %v1371_v13  ;;  %v1491_v29 = vor.u32 %v1925_v24, %v1490_v23  ;;  %v1418_v30 = vld [vmem:[#allocation3 + $0xc0] sm:$0xf]  ;;  %v1570_v31 = vld [vmem:[#allocation3 + $0x1f0] sm:$0xf]  ;;  %v1945_v32 = vld [vmem:[#allocation3 + $0x1f4] sm:$0xf0]  ;;  %v1355_v38 = vor.u32 %v1891_v27, %v1354_v26 }
  0x17   :  { %795 = vmatpush.bf16.msra.mxu1 %v1435_v17  ;;  %v1907_v33 = vld [vmem:[#allocation3 + $0xc4] sm:$0xf0]  ;;  %v1482_v34 = vld [vmem:[#allocation3 + $0x140] sm:$0xf]  ;;  %v1571_v36 = vor.u32 %v1945_v32, %v1570_v31  ;;  %v1346_v39 = vld [vmem:[#allocation3 + $0x30] sm:$0xf] }
  0x18   :  { %808 = vmatpush.bf16.msra.mxu2 %v1499_v18  ;;  %v1923_v35 = vld [vmem:[#allocation3 + $0x144] sm:$0xf0]  ;;  %v1562_v37 = vld [vmem:[#allocation3 + $0x1e0] sm:$0xf]  ;;  %v1889_v40 = vld [vmem:[#allocation3 + $0x34] sm:$0xf0]  ;;  %v1419_v42 = vor.u32 %v1907_v33, %v1418_v30 }
  0x19   :  { %820 = vmatpush.bf16.msra.mxu3 %v1571_v36  ;;  %v1943_v41 = vld [vmem:[#allocation3 + $0x1e4] sm:$0xf0]  ;;  %v1483_v43 = vor.u32 %v1923_v35, %v1482_v34  ;;  %v1410_v44 = vld [vmem:[#allocation3 + $0xb0] sm:$0xf]  ;;  %v1905_v45 = vld [vmem:[#allocation3 + $0xb4] sm:$0xf0]  ;;  %v1347_v51 = vor.u32 %v1889_v40, %v1346_v39 }
  0x1a   :  { %783 = vmatpush.bf16.msra.mxu0 %v1363_v25  ;;  %v1474_v46 = vld [vmem:[#allocation3 + $0x130] sm:$0xf]  ;;  %v1563_v47 = vor.u32 %v1943_v41, %v1562_v37  ;;  %v1921_v48 = vld [vmem:[#allocation3 + $0x134] sm:$0xf0]  ;;  %v1338_v52 = vld [vmem:[#allocation3 + $0x20] sm:$0xf]  ;;  %v1411_v55 = vor.u32 %v1905_v45, %v1410_v44 }
  0x1b   :  { %796 = vmatpush.bf16.msra.mxu1 %v1427_v28  ;;  %v1554_v49 = vld [vmem:[#allocation3 + $0x1d0] sm:$0xf]  ;;  %v1941_v50 = vld [vmem:[#allocation3 + $0x1d4] sm:$0xf0]  ;;  %v1887_v53 = vld [vmem:[#allocation3 + $0x24] sm:$0xf0]  ;;  %v1475_v56 = vor.u32 %v1921_v48, %v1474_v46 }
  0x1c   :  { %809 = vmatpush.bf16.msra.mxu2 %v1491_v29  ;;  %v1555_v54 = vor.u32 %v1941_v50, %v1554_v49  ;;  %v1402_v57 = vld [vmem:[#allocation3 + $0xa0] sm:$0xf]  ;;  %v1939_v59 = vld [vmem:[#allocation3 + $0x1c4] sm:$0xf0]  ;;  %v1339_v63 = vor.u32 %v1887_v53, %v1338_v52  ;;  %v1330_v0 = vld [vmem:[#allocation3 + $0x10] sm:$0xf] }
  0x1d   :  { %821 = vmatpush.bf16.msra.mxu3 %v1563_v47  ;;  %v1546_v58 = vld [vmem:[#allocation3 + $0x1c0] sm:$0xf]  ;;  %v1903_v60 = vld [vmem:[#allocation3 + $0xa4] sm:$0xf0]  ;;  %v1885_v1 = vld [vmem:[#allocation3 + $0x14] sm:$0xf0] }
  0x1e   :  { %784 = vmatpush.bf16.msra.mxu0 %v1355_v38  ;;  %v1466_v61 = vld [vmem:[#allocation3 + $0x120] sm:$0xf]  ;;  %v1919_v62 = vld [vmem:[#allocation3 + $0x124] sm:$0xf0]  ;;  %v1547_v2 = vor.u32 %v1939_v59, %v1546_v58  ;;  %v1403_v3 = vor.u32 %v1903_v60, %v1402_v57  ;;  %v1394_v5 = vld [vmem:[#allocation3 + $0x90] sm:$0xf]  ;;  %v1331_v11 = vor.u32 %v1885_v1, %v1330_v0 }
  0x1f   :  { %797 = vmatpush.bf16.msra.mxu1 %v1419_v42  ;;  %v1467_v4 = vor.u32 %v1919_v62, %v1466_v61  ;;  %v1538_v6 = vld [vmem:[#allocation3 + $0x1b0] sm:$0xf]  ;;  %v1937_v7 = vld [vmem:[#allocation3 + $0x1b4] sm:$0xf0]  ;;  %v1322_v12 = vld [vmem:[#allocation3] sm:$0xf] }
  0x20   :  { %810 = vmatpush.bf16.msra.mxu2 %v1483_v43  ;;  %v1901_v8 = vld [vmem:[#allocation3 + $0x94] sm:$0xf0]  ;;  %v1458_v9 = vld [vmem:[#allocation3 + $0x110] sm:$0xf]  ;;  %v1883_v13 = vld [vmem:[#allocation3 + $0x4] sm:$0xf0]  ;;  %v1539_v15 = vor.u32 %v1937_v7, %v1538_v6 }
  0x21   :  { %822 = vmatpush.bf16.msra.mxu3 %v1555_v54  ;;  %v1917_v10 = vld [vmem:[#allocation3 + $0x114] sm:$0xf0]  ;;  %v1386_v14 = vld [vmem:[#allocation3 + $0x80] sm:$0xf]  ;;  %v1395_v16 = vor.u32 %v1901_v8, %v1394_v5  ;;  %v1899_v18 = vld [vmem:[#allocation3 + $0x84] sm:$0xf0]  ;;  %v1323_v27 = vor.u32 %v1883_v13, %v1322_v12 }
  0x22   :  { %785 = vmatpush.bf16.msra.mxu0 %v1347_v51  ;;  %v1459_v17 = vor.u32 %v1917_v10, %v1458_v9  ;;  %v1530_v19 = vld [vmem:[#allocation3 + $0x1a0] sm:$0xf]  ;;  %v1935_v20 = vld [vmem:[#allocation3 + $0x1a4] sm:$0xf0]  ;;  %v1634_v23 = vld [vmem:[#allocation3 + $0x270] sm:$0xf]  ;;  %v1387_v31 = vor.u32 %v1899_v18, %v1386_v14 }
  0x23   :  { %798 = vmatpush.bf16.msra.mxu1 %v1411_v55  ;;  %v1450_v21 = vld [vmem:[#allocation3 + $0x100] sm:$0xf]  ;;  %v1915_v22 = vld [vmem:[#allocation3 + $0x104] sm:$0xf0]  ;;  %v1961_v24 = vld [vmem:[#allocation3 + $0x274] sm:$0xf0]  ;;  %v1531_v30 = vor.u32 %v1935_v20, %v1530_v19 }
  0x24   :  { %811 = vmatpush.bf16.msra.mxu2 %v1475_v56  ;;  %v1698_v25 = vld [vmem:[#allocation3 + $0x2f0] sm:$0xf]  ;;  %v1977_v26 = vld [vmem:[#allocation3 + $0x2f4] sm:$0xf0]  ;;  %v1451_v32 = vor.u32 %v1915_v22, %v1450_v21  ;;  %v1635_v35 = vor.u32 %v1961_v24, %v1634_v23  ;;  %v1626_v37 = vld [vmem:[#allocation3 + $0x260] sm:$0xf] }
  0x25   :  { %823 = vmatpush.bf16.msra.mxu3 %v1547_v2  ;;  %v1762_v28 = vld [vmem:[#allocation3 + $0x370] sm:$0xf]  ;;  %v1993_v29 = vld [vmem:[#allocation3 + $0x374] sm:$0xf0]  ;;  %v1699_v36 = vor.u32 %v1977_v26, %v1698_v25  ;;  %v1959_v38 = vld [vmem:[#allocation3 + $0x264] sm:$0xf0] }
  0x26   :  { %786 = vmatpush.bf16.msra.mxu0 %v1339_v63  ;;  %v1522_v33 = vld [vmem:[#allocation3 + $0x190] sm:$0xf]  ;;  %v1933_v34 = vld [vmem:[#allocation3 + $0x194] sm:$0xf0]  ;;  %v1763_v39 = vor.u32 %v1993_v29, %v1762_v28  ;;  %v1690_v40 = vld [vmem:[#allocation3 + $0x2e0] sm:$0xf]  ;;  %v1627_v47 = vor.u32 %v1959_v38, %v1626_v37 }
  0x27   :  { %799 = vmatpush.bf16.msra.mxu1 %v1403_v3  ;;  %v1975_v41 = vld [vmem:[#allocation3 + $0x2e4] sm:$0xf0]  ;;  %v1754_v43 = vld [vmem:[#allocation3 + $0x360] sm:$0xf]  ;;  %v1523_v45 = vor.u32 %v1933_v34, %v1522_v33  ;;  %v1618_v52 = vld [vmem:[#allocation3 + $0x250] sm:$0xf] }
  0x28   :  { %812 = vmatpush.bf16.msra.mxu2 %v1467_v4  ;;  %v75_v42 = vld [vmem:[%s2287_s0 + $0x8] sm:$0xff]  ;;  %v1514_v48 = vld [vmem:[#allocation3 + $0x180] sm:$0xf]  ;;  %v1691_v51 = vor.u32 %v1975_v41, %v1690_v40  ;;  %v1896_v53 = vld [vmem:[#allocation3 + $0x74] sm:$0xf]  ;;  %vm1246_vm0 = vcmask 523264  }
  0x29   :  { %824 = vmatpush.bf16.msra.mxu3 %v1539_v15  ;;  %v1991_v44 = vld [vmem:[#allocation3 + $0x364] sm:$0xf0]  ;;  %v202_v46 = vunpack.c.l.b16 %v75_v42  ;;  %v74_v50 = vld [vmem:[%s2287_s0] sm:$0xff]  ;;  %v1957_v59 = vld [vmem:[#allocation3 + $0x254] sm:$0xf0]  ;;  %v203_v62 = vunpack.c.h.b16 %v75_v42  ;;  %vm1273_vm1 = vcmask 261120  }
  0x2a   :  { %787 = vmatpush.bf16.msra.mxu0 %v1331_v11  ;;  %v1931_v49 = vld [vmem:[#allocation3 + $0x184] sm:$0xf0]  ;;  %v1380_v54 = vld [vmem:[#allocation3 + $0x78] sm:$0xf0]  ;;  %v200_v56 = vunpack.c.l.b16 %v74_v50  ;;  %v201_v57 = vunpack.c.h.b16 %v74_v50  ;;  %v1755_v58 = vor.u32 %v1991_v44, %v1754_v43  ;;  %v1682_v60 = vld [vmem:[#allocation3 + $0x2d0] sm:$0xf]  ;;  %v1619_v5 = vor.u32 %v1957_v59, %v1618_v52 }
  0x2b   :  { %800 = vmatpush.bf16.msra.mxu1 %v1395_v16  ;;  %v2199_v55 = vpack.c.b16 %v202_v46, %v202_v46  ;;  %v1973_v61 = vld [vmem:[#allocation3 + $0x2d4] sm:$0xf0]  ;;  %v1746_v63 = vld [vmem:[#allocation3 + $0x350] sm:$0xf]  ;;  %v1515_v1 = vor.u32 %v1931_v49, %v1514_v48  ;;  %v1383_v4 = vor.u32 %v1896_v53, %v1380_v54  ;;  %v1610_v7 = vld [vmem:[#allocation3 + $0x240] sm:$0xf]  ;;  %v2207_v14 = vpack.c.b16 %v203_v62, %v203_v62 }
  0x2c   :  { %813 = vmatpush.bf16.msra.mxu2 %v1459_v17  ;;  %v1989_v0 = vld [vmem:[#allocation3 + $0x354] sm:$0xf0]  ;;  %v2202_v2 = vpack.c.b16 %v200_v56, %v200_v56  ;;  %v2204_v3 = vpack.c.b16 %v201_v57, %v201_v57  ;;  %v1683_v6 = vor.u32 %v1973_v61, %v1682_v60  ;;  %v1894_v8 = vld [vmem:[#allocation3 + $0x64] sm:$0xf]  ;;  %v1372_v9 = vld [vmem:[#allocation3 + $0x68] sm:$0xf0] }
  0x2d   :  { %825 = vmatpush.bf16.msra.mxu3 %v1531_v30  ;;  %v1747_v10 = vor.u32 %v1989_v0, %v1746_v63  ;;  %v1955_v11 = vld [vmem:[#allocation3 + $0x244] sm:$0xf0]  ;;  %v1674_v12 = vld [vmem:[#allocation3 + $0x2c0] sm:$0xf]  ;;  %v1375_v17 = vor.u32 %v1894_v8, %v1372_v9  ;;  %v1602_v20 = vld [vmem:[#allocation3 + $0x230] sm:$0xf] }
  0x2e   :  { %788 = vmatpush.bf16.msra.mxu0 %v1323_v27  ;;  %v1971_v13 = vld [vmem:[#allocation3 + $0x2c4] sm:$0xf0]  ;;  %v1738_v15 = vld [vmem:[#allocation3 + $0x340] sm:$0xf]  ;;  %v1611_v18 = vor.u32 %v1955_v11, %v1610_v7  ;;  %v1892_v21 = vld [vmem:[#allocation3 + $0x54] sm:$0xf] }
  0x2f   :  { %801 = vmatpush.bf16.msra.mxu1 %v1387_v31  ;;  %v1987_v16 = vld [vmem:[#allocation3 + $0x344] sm:$0xf0]  ;;  %v1675_v19 = vor.u32 %v1971_v13, %v1674_v12  ;;  %v1364_v22 = vld [vmem:[#allocation3 + $0x58] sm:$0xf0]  ;;  %v1953_v24 = vld [vmem:[#allocation3 + $0x234] sm:$0xf0] }
  0x30   :  { %814 = vmatpush.bf16.msra.mxu2 %v1451_v32  ;;  %v1739_v23 = vor.u32 %v1987_v16, %v1738_v15  ;;  %v1666_v25 = vld [vmem:[#allocation3 + $0x2b0] sm:$0xf]  ;;  %v1969_v26 = vld [vmem:[#allocation3 + $0x2b4] sm:$0xf0]  ;;  %v1367_v29 = vor.u32 %v1892_v21, %v1364_v22  ;;  %v1603_v30 = vor.u32 %v1953_v24, %v1602_v20  ;;  %v1594_v32 = vld [vmem:[#allocation3 + $0x220] sm:$0xf] }
  0x31   :  { %826 = vmatpush.bf16.msra.mxu3 %v1523_v45  ;;  %789 = vmatmul.bf16.vlgmr.msra.gmra.mxu0 %v2202_v2  ;;  %v1730_v27 = vld [vmem:[#allocation3 + $0x330] sm:$0xf]  ;;  %v1985_v28 = vld [vmem:[#allocation3 + $0x334] sm:$0xf0]  ;;  %v1667_v31 = vor.u32 %v1969_v26, %v1666_v25  ;;  %v1890_v33 = vld [vmem:[#allocation3 + $0x44] sm:$0xf] }
  0x32   :  { %833 = vmatpush.bf16.msrb.mxu0 %v1635_v35  ;;  %802 = vmatmul.bf16.vlgmr.msra.gmra.mxu1 %v2204_v3  ;;  %v1356_v34 = vld [vmem:[#allocation3 + $0x48] sm:$0xf0]  ;;  %v1731_v35 = vor.u32 %v1985_v28, %v1730_v27  ;;  %v1658_v37 = vld [vmem:[#allocation3 + $0x2a0] sm:$0xf]  ;;  %v1967_v38 = vld [vmem:[#allocation3 + $0x2a4] sm:$0xf0] }
  0x33   :  { %846 = vmatpush.bf16.msrb.mxu1 %v1699_v36  ;;  %815 = vmatmul.bf16.vlgmr.msra.gmra.mxu2 %v2199_v55  ;;  %v1951_v36 = vld [vmem:[#allocation3 + $0x224] sm:$0xf0]  ;;  %v1359_v41 = vor.u32 %v1890_v33, %v1356_v34  ;;  %v1659_v43 = vor.u32 %v1967_v38, %v1658_v37  ;;  %v1586_v44 = vld [vmem:[#allocation3 + $0x210] sm:$0xf]  ;;  %v1888_v45 = vld [vmem:[#allocation3 + $0x34] sm:$0xf] }
  0x34   :  { %859 = vmatpush.bf16.msrb.mxu2 %v1763_v39  ;;  %v1722_v39 = vld [vmem:[#allocation3 + $0x320] sm:$0xf]  ;;  %v1983_v40 = vld [vmem:[#allocation3 + $0x324] sm:$0xf0]  ;;  %v1595_v42 = vor.u32 %v1951_v36, %v1594_v32  ;;  %v1348_v46 = vld [vmem:[#allocation3 + $0x38] sm:$0xf0] }
  0x35   :  { %827 = vmatpush.bf16.msra.mxu3 %v1515_v1  ;;  %v1949_v48 = vld [vmem:[#allocation3 + $0x214] sm:$0xf0]  ;;  %v1650_v49 = vld [vmem:[#allocation3 + $0x290] sm:$0xf]  ;;  %v1578_v53 = vld [vmem:[#allocation3 + $0x200] sm:$0xf] }
  0x36   :  { %834 = vmatpush.bf16.msrb.mxu0 %v1627_v47  ;;  %v1723_v47 = vor.u32 %v1983_v40, %v1722_v39  ;;  %v1965_v50 = vld [vmem:[#allocation3 + $0x294] sm:$0xf0]  ;;  %v1947_v54 = vld [vmem:[#allocation3 + $0x204] sm:$0xf0]  ;;  %v1642_v56 = vld [vmem:[#allocation3 + $0x280] sm:$0xf]  ;;  %v1587_v59 = vor.u32 %v1949_v48, %v1586_v44 }
  0x37   :  { %847 = vmatpush.bf16.msrb.mxu1 %v1691_v51  ;;  %v1714_v51 = vld [vmem:[#allocation3 + $0x310] sm:$0xf]  ;;  %v1981_v52 = vld [vmem:[#allocation3 + $0x314] sm:$0xf0]  ;;  %v1963_v57 = vld [vmem:[#allocation3 + $0x284] sm:$0xf0]  ;;  %v1651_v60 = vor.u32 %v1965_v50, %v1650_v49  ;;  %v1579_v16 = vor.u32 %v1947_v54, %v1578_v53 }
  0x38   :  { %860 = vmatpush.bf16.msrb.mxu2 %v1755_v58  ;;  %828 = vmatmul.bf16.vlgmr.msra.gmra.mxu3 %v2207_v14  ;;  %v1351_v58 = vor.u32 %v1888_v45, %v1348_v46  ;;  %v76_v61 = vld [vmem:[%s2287_s0 + $0x10] sm:$0xff]  ;;  %v1886_v62 = vld [vmem:[#allocation3 + $0x24] sm:$0xf]  ;;  %v1715_v0 = vor.u32 %v1981_v52, %v1714_v51  ;;  %v1706_v1 = vld [vmem:[#allocation3 + $0x300] sm:$0xf]  ;;  %s1309_s26 = sshll.u32 %s2298_s11, 4  ;;  %s1310_s26 = int_to_ptr.hbm [resolvable:$true] %s1309_s26 }
  0x39   :  { %872 = vmatpush.bf16.msrb.mxu3 %v1383_v4  ;;  %v1340_v63 = vld [vmem:[#allocation3 + $0x28] sm:$0xf0]  ;;  %v1979_v4 = vld [vmem:[#allocation3 + $0x304] sm:$0xf0]  ;;  %v1444_v7 = vld [vmem:[#allocation3 + $0xf8] sm:$0xf0]  ;;  %v205_v12 = vunpack.c.h.b16 %v76_v61 }
  0x3a   :  { %835 = vmatpush.bf16.msrb.mxu0 %v1619_v5  ;;  %v77_v5 = vld [vmem:[%s2287_s0 + $0x18] sm:$0xf]  ;;  %v1508_v9 = vld [vmem:[#allocation3 + $0x178] sm:$0xf0]  ;;  %v1343_v11 = vor.u32 %v1886_v62, %v1340_v63  ;;  %v1910_v24 = vld [vmem:[#allocation3 + $0xe4] sm:$0xf] }
  0x3b   :  { %848 = vmatpush.bf16.msrb.mxu1 %v1683_v6  ;;  %v1912_v6 = vld [vmem:[#allocation3 + $0xf4] sm:$0xf]  ;;  %v1572_v15 = vld [vmem:[#allocation3 + $0x1f8] sm:$0xf0]  ;;  %v1436_v25 = vld [vmem:[#allocation3 + $0xe8] sm:$0xf0] }
  0x3c   :  { %861 = vmatpush.bf16.msrb.mxu2 %v1747_v10  ;;  %v1928_v8 = vld [vmem:[#allocation3 + $0x174] sm:$0xf]  ;;  %v204_v10 = vunpack.c.l.b16 %v76_v61  ;;  %v1447_v20 = vor.u32 %v1912_v6, %v1444_v7  ;;  %v1332_v22 = vld [vmem:[#allocation3 + $0x18] sm:$0xf0]  ;;  %v1926_v26 = vld [vmem:[#allocation3 + $0x164] sm:$0xf]  ;;  %v1439_v36 = vor.u32 %v1910_v24, %v1436_v25 }
  0x3d   :  { %873 = vmatpush.bf16.msrb.mxu3 %v1375_v17  ;;  %v1944_v13 = vld [vmem:[#allocation3 + $0x1f4] sm:$0xf]  ;;  %v1643_v17 = vor.u32 %v1963_v57, %v1642_v56  ;;  %v1564_v32 = vld [vmem:[#allocation3 + $0x1e8] sm:$0xf0]  ;;  %v1428_v37 = vld [vmem:[#allocation3 + $0xd8] sm:$0xf0] }
  0x3e   :  { %836 = vmatpush.bf16.msrb.mxu0 %v1611_v18  ;;  %v206_v18 = vunpack.c.l.b16 %v77_v5  ;;  %v1884_v21 = vld [vmem:[#allocation3 + $0x14] sm:$0xf]  ;;  %v1575_v27 = vor.u32 %v1944_v13, %v1572_v15  ;;  %v2217_v28 = vpack.c.b16 %v204_v10, %v204_v10  ;;  %v1882_v38 = vld [vmem:[#allocation3 + $0x4] sm:$0xf]  ;;  %v1324_v39 = vld [vmem:[#allocation3 + $0x8] sm:$0xf0] }
  0x3f   :  { %849 = vmatpush.bf16.msrb.mxu1 %v1675_v19  ;;  %v1707_v19 = vor.u32 %v1979_v4, %v1706_v1  ;;  %v1335_v34 = vor.u32 %v1884_v21, %v1332_v22  ;;  %v1492_v45 = vld [vmem:[#allocation3 + $0x158] sm:$0xf0]  ;;  %v1940_v46 = vld [vmem:[#allocation3 + $0x1d4] sm:$0xf]  ;;  %v1327_v48 = vor.u32 %v1882_v38, %v1324_v39  ;;  %v1906_v50 = vld [vmem:[#allocation3 + $0xc4] sm:$0xf] }
  0x40   :  { %862 = vmatpush.bf16.msrb.mxu2 %v1739_v23  ;;  %v1511_v23 = vor.u32 %v1928_v8, %v1508_v9  ;;  %v2221_v33 = vpack.c.b16 %v206_v18, %v206_v18  ;;  %v1420_v51 = vld [vmem:[#allocation3 + $0xc8] sm:$0xf0]  ;;  %v1922_v54 = vld [vmem:[#allocation3 + $0x144] sm:$0xf]  ;;  %v1904_v62 = vld [vmem:[#allocation3 + $0xb4] sm:$0xf] }
  0x41   :  { %874 = vmatpush.bf16.msrb.mxu3 %v1367_v29  ;;  %v1500_v29 = vld [vmem:[#allocation3 + $0x168] sm:$0xf0]  ;;  %v1958_v56 = vld [vmem:[#allocation3 + $0x264] sm:$0xf]  ;;  %v1412_v63 = vld [vmem:[#allocation3 + $0xb8] sm:$0xf0] }
  0x42   :  { %837 = vmatpush.bf16.msrb.mxu0 %v1603_v30  ;;  %v2219_v30 = vpack.c.b16 %v205_v12, %v205_v12  ;;  %v1503_v40 = vor.u32 %v1926_v26, %v1500_v29  ;;  %v1628_v57 = vld [vmem:[#allocation3 + $0x268] sm:$0xf0]  ;;  %v1920_v1 = vld [vmem:[#allocation3 + $0x134] sm:$0xf]  ;;  %v1620_v7 = vld [vmem:[#allocation3 + $0x258] sm:$0xf0]  ;;  %v1415_v12 = vor.u32 %v1904_v62, %v1412_v63 }
  0x43   :  { %850 = vmatpush.bf16.msrb.mxu1 %v1667_v31  ;;  %v1942_v31 = vld [vmem:[#allocation3 + $0x1e4] sm:$0xf]  ;;  %v1548_v61 = vld [vmem:[#allocation3 + $0x1c8] sm:$0xf0]  ;;  %v1631_v4 = vor.u32 %v1958_v56, %v1628_v57  ;;  %v1956_v5 = vld [vmem:[#allocation3 + $0x254] sm:$0xf] }
  0x44   :  { %863 = vmatpush.bf16.msrb.mxu2 %v1731_v35  ;;  %v1908_v35 = vld [vmem:[#allocation3 + $0xd4] sm:$0xf]  ;;  %v1567_v44 = vor.u32 %v1942_v31, %v1564_v32  ;;  %v1476_v9 = vld [vmem:[#allocation3 + $0x138] sm:$0xf0]  ;;  %v1902_v13 = vld [vmem:[#allocation3 + $0xa4] sm:$0xf] }
  0x45   :  { %875 = vmatpush.bf16.msrb.mxu3 %v1359_v41  ;;  %v1924_v41 = vld [vmem:[#allocation3 + $0x154] sm:$0xf]  ;;  %v1431_v49 = vor.u32 %v1908_v35, %v1428_v37  ;;  %v1404_v15 = vld [vmem:[#allocation3 + $0xa8] sm:$0xf0]  ;;  %v1918_v18 = vld [vmem:[#allocation3 + $0x124] sm:$0xf] }
  0x46   :  { %838 = vmatpush.bf16.msrb.mxu0 %v1595_v42  ;;  %v1960_v42 = vld [vmem:[#allocation3 + $0x274] sm:$0xf]  ;;  %v1495_v53 = vor.u32 %v1924_v41, %v1492_v45  ;;  %v1468_v22 = vld [vmem:[#allocation3 + $0x128] sm:$0xf0]  ;;  %v1407_v25 = vor.u32 %v1902_v13, %v1404_v15  ;;  %v1396_v26 = vld [vmem:[#allocation3 + $0x98] sm:$0xf0] }
  0x47   :  { %851 = vmatpush.bf16.msrb.mxu1 %v1659_v43  ;;  %v1636_v43 = vld [vmem:[#allocation3 + $0x278] sm:$0xf0]  ;;  %v1936_v10 = vld [vmem:[#allocation3 + $0x1b4] sm:$0xf]  ;;  %v1532_v24 = vld [vmem:[#allocation3 + $0x1a8] sm:$0xf0]  ;;  %v1471_v29 = vor.u32 %v1918_v18, %v1468_v22 }
  0x48   :  { %864 = vmatpush.bf16.msrb.mxu2 %v1723_v47  ;;  %v1556_v47 = vld [vmem:[#allocation3 + $0x1d8] sm:$0xf0]  ;;  %v1639_v52 = vor.u32 %v1960_v42, %v1636_v43  ;;  %v1916_v31 = vld [vmem:[#allocation3 + $0x114] sm:$0xf]  ;;  %v1388_v41 = vld [vmem:[#allocation3 + $0x88] sm:$0xf0] }
  0x49   :  { %876 = vmatpush.bf16.msrb.mxu3 %v1351_v58  ;;  %v1559_v58 = vor.u32 %v1940_v46, %v1556_v47  ;;  %v1952_v32 = vld [vmem:[#allocation3 + $0x234] sm:$0xf]  ;;  %v1524_v38 = vld [vmem:[#allocation3 + $0x198] sm:$0xf0]  ;;  %v1914_v42 = vld [vmem:[#allocation3 + $0x104] sm:$0xf] }
  0x4a   :  { %839 = vmatpush.bf16.msrb.mxu0 %v1587_v59  ;;  %v1484_v59 = vld [vmem:[#allocation3 + $0x148] sm:$0xf0]  ;;  %v1932_v37 = vld [vmem:[#allocation3 + $0x194] sm:$0xf]  ;;  %v1950_v46 = vld [vmem:[#allocation3 + $0x224] sm:$0xf] }
  0x4b   :  { %852 = vmatpush.bf16.msrb.mxu1 %v1651_v60  ;;  %v1938_v60 = vld [vmem:[#allocation3 + $0x1c4] sm:$0xf]  ;;  %v1487_v6 = vor.u32 %v1922_v54, %v1484_v59  ;;  %v1452_v45 = vld [vmem:[#allocation3 + $0x108] sm:$0xf0]  ;;  %v1684_v13 = vld [vmem:[#allocation3 + $0x2d8] sm:$0xf0] }
  0x4c   :  { %865 = vmatpush.bf16.msrb.mxu2 %v1715_v0  ;;  %v1423_v0 = vor.u32 %v1906_v50, %v1420_v51  ;;  %v1551_v8 = vor.u32 %v1938_v60, %v1548_v61  ;;  %v1596_v47 = vld [vmem:[#allocation3 + $0x228] sm:$0xf0]  ;;  %v1700_v50 = vld [vmem:[#allocation3 + $0x2f8] sm:$0xf0]  ;;  %v1992_v51 = vld [vmem:[#allocation3 + $0x374] sm:$0xf] }
  0x4d   :  { %877 = vmatpush.bf16.msrb.mxu3 %v1343_v11  ;;  %v1540_v11 = vld [vmem:[#allocation3 + $0x1b8] sm:$0xf0]  ;;  %v1516_v54 = vld [vmem:[#allocation3 + $0x188] sm:$0xf0]  ;;  %v1599_v57 = vor.u32 %v1950_v46, %v1596_v47  ;;  %v1948_v60 = vld [vmem:[#allocation3 + $0x214] sm:$0xf] }
  0x4e   :  { %840 = vmatpush.bf16.msrb.mxu0 %v1579_v16  ;;  %v1623_v16 = vor.u32 %v1956_v5, %v1620_v7  ;;  %v1543_v21 = vor.u32 %v1936_v10, %v1540_v11  ;;  %v1588_v61 = vld [vmem:[#allocation3 + $0x218] sm:$0xf0]  ;;  %v1974_v63 = vld [vmem:[#allocation3 + $0x2e4] sm:$0xf]  ;;  %v1756_v5 = vld [vmem:[#allocation3 + $0x368] sm:$0xf0] }
  0x4f   :  { %853 = vmatpush.bf16.msrb.mxu1 %v1643_v17  ;;  %v1479_v17 = vor.u32 %v1920_v1, %v1476_v9  ;;  %v1580_v9 = vld [vmem:[#allocation3 + $0x208] sm:$0xf0]  ;;  %v2001_v10 = vld [vmem:[#allocation6 + $0x38] sm:$0xff]  ;;  %v1988_v15 = vld [vmem:[#allocation3 + $0x354] sm:$0xf]  ;;  %vm1300_vm2 = vcmask 57344  }
  0x50   :  { %866 = vmatpush.bf16.msrb.mxu2 %v1707_v19  ;;  %v1954_v19 = vld [vmem:[#allocation3 + $0x244] sm:$0xf] }
  0x51   :  { %841 = vmatmul.bf16.vlgmr.msrb.gmra.mxu0 %v2217_v28  ;;  %878 = vmatpush.bf16.msrb.mxu3 %v1335_v34  ;;  %v1604_v34 = vld [vmem:[#allocation3 + $0x238] sm:$0xf0]  ;;  %v1986_v22 = vld [vmem:[#allocation3 + $0x344] sm:$0xf] }
  0x52   :  { %885 = vmatpush.bf16.msra.mxu0 %v1447_v20  ;;  %854 = vmatmul.bf16.vlgmr.msrb.gmra.mxu1 %v2219_v30  ;;  %v1612_v20 = vld [vmem:[#allocation3 + $0x248] sm:$0xf0]  ;;  %v1607_v43 = vor.u32 %v1952_v32, %v1604_v34  ;;  %v1982_v32 = vld [vmem:[#allocation3 + $0x324] sm:$0xf] }
  0x53   :  { %898 = vmatpush.bf16.msra.mxu1 %v1511_v23  ;;  %867 = vmatmul.bf16.vlgmr.msrb.gmra.mxu2 %v2221_v33  ;;  %v1934_v23 = vld [vmem:[#allocation3 + $0x1a4] sm:$0xf]  ;;  %v1724_v34 = vld [vmem:[#allocation3 + $0x328] sm:$0xf0] }
  0x54   :  { %911 = vmatpush.bf16.msra.mxu2 %v1575_v27  ;;  %v1615_v27 = vor.u32 %v1954_v19, %v1612_v20  ;;  %v1535_v35 = vor.u32 %v1934_v23, %v1532_v24  ;;  %v1970_v20 = vld [vmem:[#allocation3 + $0x2c4] sm:$0xf]  ;;  %v1740_v23 = vld [vmem:[#allocation3 + $0x348] sm:$0xf0] }
  0x55   :  { %879 = vmatpush.bf16.msrb.mxu3 %v1327_v48  ;;  %v1527_v48 = vor.u32 %v1932_v37, %v1524_v38  ;;  %v1743_v24 = vor.u32 %v1986_v22, %v1740_v23  ;;  %v1964_v37 = vld [vmem:[#allocation3 + $0x294] sm:$0xf]  ;;  %v1652_v38 = vld [vmem:[#allocation3 + $0x298] sm:$0xf0] }
  0x56   :  { %886 = vmatpush.bf16.msra.mxu0 %v1439_v36  ;;  %v1460_v36 = vld [vmem:[#allocation3 + $0x118] sm:$0xf0] }
  0x57   :  { %899 = vmatpush.bf16.msra.mxu1 %v1503_v40  ;;  %v1898_v40 = vld [vmem:[#allocation3 + $0x84] sm:$0xf]  ;;  %v2005_v22 = vld [vmem:[#allocation6 + $0x58] sm:$0xff] }
  0x58   :  { %912 = vmatpush.bf16.msra.mxu2 %v1567_v44  ;;  %880 = vmatmul.bf16.vlgmr.msrb.gmra.mxu3 %v2202_v2  ;;  %v1900_v2 = vld [vmem:[#allocation3 + $0x94] sm:$0xf]  ;;  %v1463_v44 = vor.u32 %v1916_v31, %v1460_v36  ;;  %v1391_v56 = vor.u32 %v1898_v40, %v1388_v41  ;;  %v1660_v31 = vld [vmem:[#allocation3 + $0x2a8] sm:$0xf0]  ;;  %v1727_v36 = vor.u32 %v1982_v32, %v1724_v34  ;;  %v1716_v40 = vld [vmem:[#allocation3 + $0x318] sm:$0xf0] }
  0x59   :  { %924 = vmatpush.bf16.msra.mxu3 %v1639_v52  ;;  %v1399_v39 = vor.u32 %v1900_v2, %v1396_v26  ;;  %v1764_v52 = vld [vmem:[#allocation3 + $0x378] sm:$0xf0] }
  0x5a   :  { %887 = vmatpush.bf16.msra.mxu0 %v1431_v49  ;;  %v1976_v49 = vld [vmem:[#allocation3 + $0x2f4] sm:$0xf]  ;;  %v1767_v62 = vor.u32 %v1992_v51, %v1764_v52  ;;  %v1668_v2 = vld [vmem:[#allocation3 + $0x2b8] sm:$0xf0] }
  0x5b   :  { %900 = vmatpush.bf16.msra.mxu1 %v1495_v53  ;;  %v1930_v53 = vld [vmem:[#allocation3 + $0x184] sm:$0xf]  ;;  %v1703_v59 = vor.u32 %v1976_v49, %v1700_v50  ;;  %v1732_v26 = vld [vmem:[#allocation3 + $0x338] sm:$0xf0]  ;;  %v1999_v49 = vld [vmem:[#allocation6 + $0x28] sm:$0xff] }
  0x5c   :  { %913 = vmatpush.bf16.msra.mxu2 %v1559_v58  ;;  %v1455_v58 = vor.u32 %v1914_v42, %v1452_v45  ;;  %v1519_v1 = vor.u32 %v1930_v53, %v1516_v54  ;;  %v1962_v42 = vld [vmem:[#allocation3 + $0x284] sm:$0xf]  ;;  %v1708_v45 = vld [vmem:[#allocation3 + $0x308] sm:$0xf0]  ;;  %v1997_v51 = vld [vmem:[#allocation6 + $0x18] sm:$0xff] }
  0x5d   :  { %925 = vmatpush.bf16.msra.mxu3 %v1631_v4  ;;  %v1990_v4 = vld [vmem:[#allocation3 + $0x364] sm:$0xf]  ;;  %v1996_v52 = vld [vmem:[#allocation6 + $0x10] sm:$0xff]  ;;  %v1995_v53 = vld [vmem:[#allocation6 + $0x8] sm:$0xff] }
  0x5e   :  { %888 = vmatpush.bf16.msra.mxu0 %v1423_v0  ;;  %v1692_v0 = vld [vmem:[#allocation3 + $0x2e8] sm:$0xf0]  ;;  %v1759_v11 = vor.u32 %v1990_v4, %v1756_v5  ;;  %v1998_v50 = vld [vmem:[#allocation6 + $0x20] sm:$0xff] }
  0x5f   :  { %901 = vmatpush.bf16.msra.mxu1 %v1487_v6  ;;  %v1591_v6 = vor.u32 %v1948_v60, %v1588_v61  ;;  %v1695_v7 = vor.u32 %v1974_v63, %v1692_v0 }
  0x60   :  { %914 = vmatpush.bf16.msra.mxu2 %v1551_v8  ;;  %v1946_v8 = vld [vmem:[#allocation3 + $0x204] sm:$0xf] }
  0x61   :  { %926 = vmatpush.bf16.msra.mxu3 %v1623_v16  ;;  %v1748_v16 = vld [vmem:[#allocation3 + $0x358] sm:$0xf0] }
  0x62   :  { %889 = vmatpush.bf16.msra.mxu0 %v1415_v12  ;;  %v1972_v12 = vld [vmem:[#allocation3 + $0x2d4] sm:$0xf]  ;;  %v1751_v19 = vor.u32 %v1988_v15, %v1748_v16 }
  0x63   :  { %902 = vmatpush.bf16.msra.mxu1 %v1479_v17  ;;  %v1583_v17 = vor.u32 %v1946_v8, %v1580_v9  ;;  %v1687_v18 = vor.u32 %v1972_v12, %v1684_v13  ;;  %v2009_v8 = vld [vmem:[#allocation6 + $0x78] sm:$0xff]  ;;  %v2007_v12 = vld [vmem:[#allocation6 + $0x68] sm:$0xff] }
  0x64   :  { %915 = vmatpush.bf16.msra.mxu2 %v1543_v21  ;;  %v1676_v21 = vld [vmem:[#allocation3 + $0x2c8] sm:$0xf0] }
  0x65   :  { %927 = vmatpush.bf16.msra.mxu3 %v1615_v27 }
  0x66   :  { %890 = vmatpush.bf16.msra.mxu0 %v1407_v25  ;;  %v1968_v25 = vld [vmem:[#allocation3 + $0x2b4] sm:$0xf] }
  0x67   :  { %903 = vmatpush.bf16.msra.mxu1 %v1471_v29  ;;  %v1671_v27 = vor.u32 %v1968_v25, %v1668_v2  ;;  %v1966_v29 = vld [vmem:[#allocation3 + $0x2a4] sm:$0xf]  ;;  %v2003_v25 = vld [vmem:[#allocation6 + $0x48] sm:$0xff] }
  0x68   :  { %916 = vmatpush.bf16.msra.mxu2 %v1535_v35  ;;  %v1663_v35 = vor.u32 %v1966_v29, %v1660_v31 }
  0x69   :  { %928 = vmatpush.bf16.msra.mxu3 %v1607_v43  ;;  %v1644_v43 = vld [vmem:[#allocation3 + $0x288] sm:$0xf0] }
  0x6a   :  { %891 = vmatpush.bf16.msra.mxu0 %v1399_v39  ;;  %v1980_v39 = vld [vmem:[#allocation3 + $0x314] sm:$0xf]  ;;  %v1647_v46 = vor.u32 %v1962_v42, %v1644_v43 }
  0x6b   :  { %904 = vmatpush.bf16.msra.mxu1 %v1463_v44  ;;  %v1719_v41 = vor.u32 %v1980_v39, %v1716_v40  ;;  %v1978_v44 = vld [vmem:[#allocation3 + $0x304] sm:$0xf] }
  0x6c   :  { %917 = vmatpush.bf16.msra.mxu2 %v1527_v48  ;;  %v1711_v47 = vor.u32 %v1978_v44, %v1708_v45  ;;  %v2000_v48 = vld [vmem:[#allocation6 + $0x30] sm:$0xff] }
  0x6d   :  { %929 = vmatpush.bf16.msra.mxu3 %v1599_v57 }
  0x6e   :  { %892 = vmatpush.bf16.msra.mxu0 %v1391_v56 }
  0x6f   :  { %905 = vmatpush.bf16.msra.mxu1 %v1455_v58  ;;  %v1994_v58 = vld [vmem:[#allocation6] sm:$0xff] }
  0x70   :  { %918 = vmatpush.bf16.msra.mxu2 %v1519_v1 }
  0x71   :  { %893 = vmatmul.bf16.vlgmr.msra.gmra.mxu0 %v2204_v3  ;;  %930 = vmatpush.bf16.msra.mxu3 %v1591_v6  ;;  %v1679_v3 = vor.u32 %v1970_v20, %v1676_v21  ;;  %v2006_v20 = vld [vmem:[#allocation6 + $0x60] sm:$0xff] }
  0x72   :  { %937 = vmatpush.bf16.msrb.mxu0 %v1703_v59  ;;  %906 = vmatmul.bf16.vlgmr.msra.gmra.mxu1 %v2199_v55  ;;  %v1984_v55 = vld [vmem:[#allocation3 + $0x334] sm:$0xf] }
  0x73   :  { %950 = vmatpush.bf16.msrb.mxu1 %v1767_v62  ;;  %919 = vmatmul.bf16.vlgmr.msra.gmra.mxu2 %v2207_v14  ;;  %v1735_v14 = vor.u32 %v1984_v55, %v1732_v26  ;;  %v2002_v26 = vld [vmem:[#allocation6 + $0x40] sm:$0xff] }
  0x74   :  { %1099 = vmatpush.bf16.msrb.mxu2 %v2001_v10  ;;  %v2008_v10 = vld [vmem:[#allocation6 + $0x70] sm:$0xff] }
  0x75   :  { %931 = vmatpush.bf16.msra.mxu3 %v1583_v17 }
  0x76   :  { %938 = vmatpush.bf16.msrb.mxu0 %v1695_v7 }
  0x77   :  { %951 = vmatpush.bf16.msrb.mxu1 %v1759_v11 }
  0x78   :  { %932 = vmatmul.bf16.vlgmr.msra.gmra.mxu3 %v2217_v28  ;;  %v1655_v28 = vor.u32 %v1964_v37, %v1652_v38  ;;  %1100 = vmatpush.bf16.msrb.mxu2 %v2000_v48  ;;  %v2017_v48 = vld [vmem:[%s2292_s5 + $0x38] sm:$0xff] }
  0x79   :  { %1112 = vmatpush.bf16.msrb.mxu3 %v2009_v8 }
  0x7a   :  { %939 = vmatpush.bf16.msrb.mxu0 %v1687_v18 }
  0x7b   :  { %952 = vmatpush.bf16.msrb.mxu1 %v1751_v19 }
  0x7c   :  { %1101 = vmatpush.bf16.msrb.mxu2 %v1999_v49  ;;  %v2016_v49 = vld [vmem:[%s2292_s5 + $0x30] sm:$0xff] }
  0x7d   :  { %1113 = vmatpush.bf16.msrb.mxu3 %v2008_v10 }
  0x7e   :  { %940 = vmatpush.bf16.msrb.mxu0 %v1679_v3  ;;  %v2004_v3 = vld [vmem:[#allocation6 + $0x50] sm:$0xff] }
  0x7f   :  { %953 = vmatpush.bf16.msrb.mxu1 %v1743_v24 }
  0x80   :  { %1102 = vmatpush.bf16.msrb.mxu2 %v1998_v50  ;;  %v2015_v50 = vld [vmem:[%s2292_s5 + $0x28] sm:$0xff] }
  0x81   :  { %1114 = vmatpush.bf16.msrb.mxu3 %v2007_v12  ;;  %v1266_v12 = vld [vmem:[#allocation2] sm:$0x1] }
  0x82   :  { %941 = vmatpush.bf16.msrb.mxu0 %v1671_v27 }
  0x83   :  { %954 = vmatpush.bf16.msrb.mxu1 %v1735_v14 }
  0x84   :  { %1103 = vmatpush.bf16.msrb.mxu2 %v1997_v51  ;;  %v2014_v51 = vld [vmem:[%s2292_s5 + $0x20] sm:$0xff] }
  0x85   :  { %1115 = vmatpush.bf16.msrb.mxu3 %v2006_v20 }
  0x86   :  { %942 = vmatpush.bf16.msrb.mxu0 %v1663_v35 }
  0x87   :  { %955 = vmatpush.bf16.msrb.mxu1 %v1727_v36 }
  0x88   :  { %1104 = vmatpush.bf16.msrb.mxu2 %v1996_v52  ;;  %v2013_v52 = vld [vmem:[%s2292_s5 + $0x18] sm:$0xff] }
  0x89   :  { %1116 = vmatpush.bf16.msrb.mxu3 %v2005_v22  ;;  %v1264_v22 = vld [vmem:[%s2296_s9] sm:$0x1] }
  0x8a   :  { %943 = vmatpush.bf16.msrb.mxu0 %v1655_v28 }
  0x8b   :  { %956 = vmatpush.bf16.msrb.mxu1 %v1719_v41 }
  0x8c   :  { %1105 = vmatpush.bf16.msrb.mxu2 %v1995_v53  ;;  %v2012_v53 = vld [vmem:[%s2292_s5 + $0x10] sm:$0xff] }
  0x8d   :  { %1117 = vmatpush.bf16.msrb.mxu3 %v2004_v3 }
  0x8e   :  { %944 = vmatpush.bf16.msrb.mxu0 %v1647_v46 }
  0x8f   :  { %957 = vmatpush.bf16.msrb.mxu1 %v1711_v47 }
  0x90   :  { %1106 = vmatpush.bf16.msrb.mxu2 %v1994_v58  ;;  %v2010_v58 = vld [vmem:[%s2292_s5] sm:$0xff] }
  0x91   :  { %945 = vmatmul.bf16.vlgmr.msrb.gmra.mxu0 %v2219_v30  ;;  %v190_v30 = vld [vmem:[%s2289_s2] sm:$0x3]  ;;  %1118 = vmatpush.bf16.msrb.mxu3 %v2003_v25 }
  0x92   :  { %958 = vmatmul.bf16.vlgmr.msrb.gmra.mxu1 %v2221_v33  ;;  %v192_v33 = vperm.slane %v190_v30, 0  ;;  %v193_v27 = vperm.slane %v190_v30, 1  ;;  %1195 = vmatpush.bf16.msra.mxu0 %v2017_v48  ;;  %v2021_v30 = vld [vmem:[%s2294_s7 + $0x18] sm:$0xff] }
  0x93   :  { %1254 = vmatpush.bf16.msra.mxu1 %v2021_v30 }
  0x95   :  { %1119 = vmatpush.bf16.msrb.mxu3 %v2002_v26 }
  0x96   :  { %1196 = vmatpush.bf16.msra.mxu0 %v2016_v49 }
  0x9a   :  { %1197 = vmatpush.bf16.msra.mxu0 %v2015_v50 }
  0x9e   :  { %1198 = vmatpush.bf16.msra.mxu0 %v2014_v51 }
  0xa2   :  { %1199 = vmatpush.bf16.msra.mxu0 %v2013_v52 }
  0xa6   :  { %1200 = vmatpush.bf16.msra.mxu0 %v2012_v53 }
  0xae   :  { %v790_v54 = vpop.f32.mrf.mxu0 }
  0xaf   :  { %v803_v56 = vpop.f32.mrf.mxu1  ;;  %v791_v62 = vadd.f32 %v790_v54, %v192_v33  ;;  %v2020_v33 = vld [vmem:[%s2294_s7 + $0x10] sm:$0xff] }
  0xb0   :  { %1255 = vmatpush.bf16.msra.mxu1 %v2020_v33 }
  0xb1   :  { %v804_v0 = vadd.f32 %v803_v56, %v791_v62 }
  0xb6   :  { %v816_v57 = vpop.f32.mrf.mxu2  ;;  %v792_v59 = vpop.f32.mrf.mxu0 }
  0xb7   :  { %v805_v60 = vpop.f32.mrf.mxu1  ;;  %v817_v4 = vadd.f32 %v816_v57, %v804_v0  ;;  %v2011_v57 = vld [vmem:[%s2292_s5 + $0x8] sm:$0xff]  ;;  %v2031_v59 = vld [vmem:[%s2291_s4] ss:$0 sm:$0xff] }
  0xb8   :  { %1201 = vmatpush.bf16.msra.mxu0 %v2011_v57 }
  0xbb   :  { %v829_v61 = vpop.f32.mrf.mxu3 }
  0xbc   :  { %v830_v5 = vadd.f32 %v829_v61, %v817_v4  ;;  %1202 = vmatpush.bf16.msra.mxu0 %v2010_v58  ;;  %v2019_v4 = vld [vmem:[%s2294_s7 + $0x8] sm:$0xff] }
  0xbd   :  { %1256 = vmatpush.bf16.msra.mxu1 %v2019_v4 }
  0xbe   :  { %v818_v63 = vpop.f32.mrf.mxu2 }
  0xc3   :  { %v831_v1 = vpop.f32.mrf.mxu3 }
  0xce   :  { %v842_v6 = vpop.f32.mrf.mxu0 }
  0xcf   :  { %v855_v7 = vpop.f32.mrf.mxu1  ;;  %v843_v9 = vadd.f32 %v842_v6, %v830_v5  ;;  %v2018_v5 = vld [vmem:[%s2294_s7] sm:$0xff] }
  0xd0   :  { %1257 = vmatpush.bf16.msra.mxu1 %v2018_v5  ;;  %v2032_v6 = vld [vmem:[%s2293_s6] ss:$0 sm:$0xff] }
  0xd1   :  { %v856_v11 = vadd.f32 %v855_v7, %v843_v9 }
  0xd6   :  { %v868_v13 = vpop.f32.mrf.mxu2  ;;  %v844_v16 = vpop.f32.mrf.mxu0 }
  0xd7   :  { %v869_v15 = vadd.f32 %v868_v13, %v856_v11  ;;  %v857_v17 = vpop.f32.mrf.mxu1  ;;  %v2122_v13 = vmov 0  }
  0xd8   :  { %2030 = vset.pattern.permute.xlu0 %v2122_v13 }
  0xd9   :  { %v963_v18 = vmax.f32 %v869_v15, 0.0  ;;  %1269 = vperm.xlu0 %2030, %v1266_v12   ;;  %v2033_v15 = vld [vmem:[%s2295_s8] ss:$0 sm:$0xff]  ;;  %s2123_s8 = smov [#allocation8]  }
  0xda   :  { %s1307_s23 = sshll.u32 %s2123_s8, 4  ;;  %s1308_s23 = int_to_ptr.vmem [resolvable:$true] %s1307_s23 }
  0xdb   :  { %v965_v19 = vpack.c.bf16 %v963_v18, %v963_v18  ;;  %v881_v21 = vpop.f32.mrf.mxu3 }
  0xdc   :  { %v882_v32 = vadd.f32 %v881_v21, %v193_v27 }
  0xdd   :  { %1107 = vmatmul.bf16.vlgmr.msrb.gmra.mxu2 %v965_v19 }
  0xde   :  { %v870_v23 = vpop.f32.mrf.mxu2 }
  0xe3   :  { %v883_v24 = vpop.f32.mrf.mxu3 }
  0xee   :  { %v894_v2 = vpop.f32.mrf.mxu0 }
  0xef   :  { %v907_v55 = vpop.f32.mrf.mxu1  ;;  %v895_v35 = vadd.f32 %v894_v2, %v882_v32 }
  0xf1   :  { %v908_v37 = vadd.f32 %v907_v55, %v895_v35 }
  0xf6   :  { %v896_v14 = vpop.f32.mrf.mxu0  ;;  %v920_v29 = vpop.f32.mrf.mxu2 }
  0xf7   :  { %v909_v31 = vpop.f32.mrf.mxu1  ;;  %v921_v39 = vadd.f32 %v920_v29, %v908_v37 }
  0xfb   :  { %v933_v34 = vpop.f32.mrf.mxu3 }
  0xfc   :  { %v934_v40 = vadd.f32 %v933_v34, %v921_v39 }
  0xfe   :  { %v922_v36 = vpop.f32.mrf.mxu2 }
 0x103   :  { %v935_v38 = vpop.f32.mrf.mxu3 }
 0x10e   :  { %v946_v28 = vpop.f32.mrf.mxu0 }
 0x10f   :  { %v947_v41 = vadd.f32 %v946_v28, %v934_v40  ;;  %v959_v42 = vpop.f32.mrf.mxu1 }
 0x111   :  { %v960_v43 = vadd.f32 %v959_v42, %v947_v41 }
 0x113   :  { %v964_v44 = vmax.f32 %v960_v43, 0.0 }
 0x115   :  { %v966_v45 = vpack.c.bf16 %v964_v44, %v964_v44 }
 0x116   :  { %v948_v46 = vpop.f32.mrf.mxu0 }
 0x117   :  { %v961_v47 = vpop.f32.mrf.mxu1  ;;  %1120 = vmatmul.bf16.vlgmr.msrb.gmra.mxu3 %v966_v45 }
 0x14b   :  { %v1270_v23 = vpop.permute.xlu0 %1269 }
 0x14c   :  { %v1272_v3 = vperm.slane %v1270_v23, 0 }
 0x160   :  { %v1108_v54 = vpop.f32.mrf.mxu2 }
 0x161   :  { %v1109_v60 = vadd.f32 %v2031_v59, %v1108_v54 }
 0x168   :  { %v1110_v56 = vpop.f32.mrf.mxu2 }
 0x19a   :  { %v1121_v61 = vpop.f32.mrf.mxu3 }
 0x19b   :  { %v1122_v62 = vadd.f32 %v1121_v61, %v1109_v60 }
 0x19d   :  { %v1125_v63 = vmax.f32 %v1122_v62, 0.0 }
 0x19f   :  { %v1126_v0 = vpack.c.bf16 %v1125_v63, %v1125_v63 }
 0x1a1   :  { %1203 = vmatmul.bf16.vlgmr.msra.gmra.mxu0 %v1126_v0 }
 0x1a2   :  { %v1123_v1 = vpop.f32.mrf.mxu3 }
 0x21e   :  { %v1204_v7 = vpop.f32.mrf.mxu0 }
 0x21f   :  { %v1205_v8 = vadd.f32 %v2032_v6, %v1204_v7 }
 0x221   :  { %v1208_v9 = vmax.f32 %v1205_v8, 0.0 }
 0x223   :  { %v1209_v10 = vpack.c.bf16 %v1208_v9, %v1208_v9 }
 0x225   :  { %1880 = vmatmul.msk.bf16.vlgmr.msra.gmra.mxu1 %vm1246_vm0, %v1209_v10 }
 0x226   :  { %v1206_v11 = vpop.f32.mrf.mxu0 }
 0x2a2   :  { %v1259_v16 = vpop.f32.mrf.mxu1 }
 0x2a3   :  { %v1260_v17 = vadd.f32 %v2033_v15, %v1259_v16 }
 0x2a5   :  { %v1263_v18 = vmax.f32 %v1260_v17, 0.0 }
 0x2a7   :  { %v1265_v19 = vpack.c.bf16 %v1263_v18, %v1263_v18 }
 0x2a9   :  { %v1278_v20 = vsel %vm1273_vm1, %v1265_v19, 0 }
 0x2aa   :  { %v1261_v21 = vpop.f32.mrf.mxu1  ;;  %1287 = vmatpush.bf16.xpose.msra.mxu2 %v1278_v20 }
 0x2b1   :  { %1881 = vmatmul.msk.bf16.vlgmr.msra.gmra.mxu2 %vm1273_vm1, %v1264_v22 }
 0x334   :  { %v1289_v24 = vpop.f32.mrf.mxu2 }
 0x335   :  { %v1290_v25 = vadd.f32 %v1289_v24, %v1272_v3 }
 0x337   :  { %v1293_v2 = vsub.f32 0.0, %v1290_v25 }
 0x339   :  { %v1294_v55 = vmul.f32 1.442695, %v1293_v2 }
 0x33b   :  { %2034 = vpow2.f32 %v1294_v55 }
 0x33c   :  { %v1291_v26 = vpop.f32.mrf.mxu2 }
 0x341   :  { %v2035_v27 = vpop.eup %2034 }
 0x342   :  { %v1296_v14 = vadd.f32 1.0, %v2035_v27 }
 0x344   :  { %2036 = vrcp.f32 %v1296_v14 }
 0x34a   :  { %v2037_v29 = vpop.eup %2036 }
 0x34b   :  { %v1298_v31 = vmax.f32 %v2037_v29, 0.0 }
 0x34d   :  { %v1299_v32 = vmin.f32 %v1298_v31, 1.0 }
 0x34f   :  { %1301 = vst.msk [vmem:[#allocation8] sm:$0x1] %vm1300_vm2, %v1299_v32 }
 0x350   :  { %1312 = dma.vmem_to_hbm [thread:$0]  %s1308_s23, 16, %s1310_s26, [#allocation5]  }
 0x351   :  { %2114 = dma.done.wait [#allocation5], 16  }
 0x352   :  { %2115 = vsyncadd [#allocation5], 4294967280 }
 0x353   :  { %1317 = vsyncpa [#allocation4], 1 }
 0x354   :  { %1318 = vsyncpa [#allocation7], 1 }
 0x355   :  { %1319 = vsyncpa [#allocation5], 1 }

</bundles_post_ra>
